<compile_context>
chip_gen: v7x
topology: tpu7x:2x2x1
jax: 0.10.0
libtpu: 0.0.40
codegen_flags: <defaults>
</compile_context>

<pallas_src>
import numpy as np
import jax
import jax.numpy as jnp
from jax.experimental import pallas as pl
from jax.experimental.pallas import tpu as pltpu

_PI = float(np.pi)
_HALF_PI = 0.5 * float(np.pi)


def _time_embedding_kernel_t(t_ref, out_ref):
    # t_ref:   (1, TB)    VMEM  — lane-dense batch row
    # out_ref: (2H, TB)   VMEM  — sublanes = features (sin rows then cos rows),
    #                              lanes = batch (unmasked lane-dense stores)
    two_h = out_ref.shape[0]
    half = two_h // 2

    # Sublane index column 0..2H-1, built in-kernel (no freqs input DMA).
    row = jax.lax.broadcasted_iota(jnp.int32, (two_h, 1), 0)            # (2H, 1)
    base = jnp.where(row < half, row, row - half).astype(jnp.float32)
    # Frequency column: 2*pi / (2*(k+1)) == pi / (k+1), duplicated for cos rows.
    freqs = _PI / (base + 1.0)                                          # (2H, 1)
    # Phase offset: 0 for sin rows, pi/2 for cos rows (cos x = sin(x + pi/2)).
    offset = jnp.where(row < half,
                       jnp.float32(0.0), jnp.float32(_HALF_PI))         # (2H, 1)

    t = t_ref[...]                                                      # (1, TB)
    phase = freqs * t + offset                                          # (2H, TB)
    out_ref[...] = jnp.sin(phase).astype(out_ref.dtype)                 # one EUP pass,
                                                                        # unmasked stores


def _choose_block_b(B, max_block=4096):
    """>= 2 roughly balanced grid steps for moderate B (v7x megacore), capped
    for very large B; always a multiple of 128 (lane alignment)."""
    target = -(-B // 2)                       # cdiv(B, 2)
    target = ((target + 127) // 128) * 128    # round up to 128 lanes
    return max(128, min(target, max_block))


def time_embedding(t, tdim=10, out_dtype=jnp.float32):
    """t: (B, 1) float -> (B, 2*(tdim//2)), matching the torch module.

    Internally computes a (2H, B) lane-dense block and transposes in the
    wrapper; fused consumers should use the transposed form directly.
    """
    assert t.ndim == 2 and t.shape[-1] == 1
    half = tdim // 2
    two_h = 2 * half
    B = t.shape[0]
    t_row = t.astype(jnp.float32).reshape(1, B)          # lane-dense batch
    out_shape_t = jax.ShapeDtypeStruct((two_h, B), out_dtype)

    if B <= 256:
        # Small batch: single whole-array block, no grid overhead.
        out_t = pl.pallas_call(
            _time_embedding_kernel_t,
            out_shape=out_shape_t,
            in_specs=[pl.BlockSpec(memory_space=pltpu.MemorySpace.VMEM)],
            out_specs=pl.BlockSpec(memory_space=pltpu.MemorySpace.VMEM),
        )(t_row)
    else:
        # Moderate/large batch: tile the (lane) batch dim; 'parallel' lets v7x
        # use both TensorCores (neutral on v5e/v6e). Ragged final block is
        # handled by Pallas partial-block write masking.
        block_b = _choose_block_b(B)
        grid = (pl.cdiv(B, block_b),)
        out_t = pl.pallas_call(
            _time_embedding_kernel_t,
            out_shape=out_shape_t,
            grid_spec=pltpu.PrefetchScalarGridSpec(
                num_scalar_prefetch=0,
                grid=grid,
                in_specs=[pl.BlockSpec((1, block_b), lambda i: (0, i))],
                out_specs=pl.BlockSpec((two_h, block_b), lambda i: (0, i)),
            ),
            compiler_params=pltpu.CompilerParams(
                dimension_semantics=("parallel",)),
        )(t_row)

    # Match torch layout (B, 2H).  A fused downstream kernel should consume
    # out_t (2H, B) directly instead and absorb this transpose.
    return out_t.T


def _numpy_reference(t_np, tdim):
    freqs = (2.0 * np.pi / np.arange(2, tdim + 1, 2, dtype=np.float32))[None, :]
    return np.concatenate([np.sin(freqs * t_np), np.cos(freqs * t_np)], axis=-1)


if __name__ == "__main__":
    tdim = 10
    key = jax.random.PRNGKey(0)
    k0, k1, k2 = jax.random.split(key, 3)

    # Small-batch path (single whole-array block).
    B_small = 8
    t_small = jax.random.uniform(k0, (B_small, 1), dtype=jnp.float32)
    out_small = jax.block_until_ready(time_embedding(t_small, tdim=tdim))
    ref_small = _numpy_reference(np.asarray(t_small), tdim)
    assert out_small.shape == (B_small, 2 * (tdim // 2))
    np.testing.assert_allclose(np.asarray(out_small), ref_small, rtol=1e-5, atol=1e-5)

    # Ragged batch (B % block_b != 0): exercises Pallas partial-block masking.
    B_ragged = 600
    t_ragged = jax.random.uniform(k1, (B_ragged, 1), dtype=jnp.float32)
    out_ragged = jax.block_until_ready(time_embedding(t_ragged, tdim=tdim))
    ref_ragged = _numpy_reference(np.asarray(t_ragged), tdim)
    assert out_ragged.shape == (B_ragged, 2 * (tdim // 2))
    np.testing.assert_allclose(np.asarray(out_ragged), ref_ragged, rtol=1e-5, atol=1e-5)

    # Larger batch: 2 balanced 'parallel' grid steps.
    B_large = 1024
    t_large = jax.random.uniform(k2, (B_large, 1), dtype=jnp.float32)
    out_large = jax.block_until_ready(time_embedding(t_large, tdim=tdim))
    ref_large = _numpy_reference(np.asarray(t_large), tdim)
    assert out_large.shape == (B_large, 2 * (tdim // 2))
    np.testing.assert_allclose(np.asarray(out_large), ref_large, rtol=1e-5, atol=1e-5)

    print("KERNEL_OK")
</pallas_src>

<mosaic_0001>
module attributes {stable_mosaic.version = 11 : i64} {
  func.func @_time_embedding_kernel_t(%arg0: memref<1x8xf32, #tpu.memory_space<vmem>>, %arg1: memref<10x8xf32, #tpu.memory_space<vmem>>) attributes {dimension_semantics = [], scalar_prefetch = 0 : i64, scratch_operands = 0 : i64, tpu.core_type = #tpu.core_type<tc>} {
    %0 = tpu.iota {dimensions = array<i32: 0>} : vector<10x1xi32>
    %c5_i32 = arith.constant 5 : i32
    %1 = vector.broadcast %c5_i32 : i32 to vector<10x1xi32>
    %2 = arith.cmpi slt, %0, %1 : vector<10x1xi32>
    %c5_i32_0 = arith.constant 5 : i32
    %3 = vector.broadcast %c5_i32_0 : i32 to vector<10x1xi32>
    %4 = arith.subi %0, %3 : vector<10x1xi32>
    %5 = arith.select %2, %0, %4 : vector<10x1xi1>, vector<10x1xi32>
    %6 = arith.sitofp %5 : vector<10x1xi32> to vector<10x1xf32>
    %cst = arith.constant 1.000000e+00 : f32
    %7 = vector.broadcast %cst : f32 to vector<10x1xf32>
    %8 = arith.addf %6, %7 : vector<10x1xf32>
    %cst_1 = arith.constant 3.14159274 : f32
    %9 = vector.broadcast %cst_1 : f32 to vector<10x1xf32>
    %10 = arith.divf %9, %8 : vector<10x1xf32>
    %c5_i32_2 = arith.constant 5 : i32
    %11 = vector.broadcast %c5_i32_2 : i32 to vector<10x1xi32>
    %12 = arith.cmpi slt, %0, %11 : vector<10x1xi32>
    %cst_3 = arith.constant 0.000000e+00 : f32
    %cst_4 = arith.constant 1.57079637 : f32
    %13 = vector.broadcast %cst_3 : f32 to vector<10x1xf32>
    %14 = vector.broadcast %cst_4 : f32 to vector<10x1xf32>
    %15 = arith.select %12, %13, %14 : vector<10x1xi1>, vector<10x1xf32>
    %c0 = arith.constant 0 : index
    %c0_5 = arith.constant 0 : index
    %16 = vector.load %arg0[%c0, %c0_5] : memref<1x8xf32, #tpu.memory_space<vmem>>, vector<1x8xf32>
    %17 = vector.broadcast %10 : vector<10x1xf32> to vector<10x8xf32>
    %18 = vector.broadcast %16 : vector<1x8xf32> to vector<10x8xf32>
    %19 = arith.mulf %17, %18 : vector<10x8xf32>
    %20 = vector.broadcast %15 : vector<10x1xf32> to vector<10x8xf32>
    %21 = arith.addf %19, %20 : vector<10x8xf32>
    %22 = math.sin %21 : vector<10x8xf32>
    %c0_6 = arith.constant 0 : index
    %c0_7 = arith.constant 0 : index
    %23 = vector.load %arg1[%c0_6, %c0_7] : memref<10x8xf32, #tpu.memory_space<vmem>>, vector<10x8xf32>
    tpu.vector_store %arg1[%c0_6, %c0_7], %22 {strides = array<i32>} : memref<10x8xf32, #tpu.memory_space<vmem>>, vector<10x8xf32>,
    return
  }
}

</mosaic_0001>

<bundles_post_ra>
// kernel: tpu_custom_call.1
= control target key start
LH: loop header
LB: loop body
LE: loop exit
PB: predicated region body
PF: predicated region fallthrough
CT: control target
= control target key end

     0   :  { %6 = vsyncpa [#allocation3], 0  ;;  %s330_s6 = smov [#allocation2]   ;;  %s438_s0 = inlined_call_operand.hbm [shape: f32[1,8], index: 0, kind: input, shape index: {}]   ;;  %s439_s1 = inlined_call_operand.vmem [shape: f32[10,8], index: 1, kind: output, shape index: {}]  }
   0x1   :  { %s13_s7 = sshll.u32 %s330_s6, 4  ;;  %s306_s10 = scalar_lea.hbm %s438_s0, 16  ;;  %s14_s7 = int_to_ptr.vmem [resolvable:$true] %s13_s7 }
   0x2   :  { %p307_p0 = scmp.ne.s32.totalorder %s438_s0, %s306_s10  ;;  %p310_p1 = scmp.lt.u32.totalorder %s306_s10, %s438_s0 }
   0x4   :  { %p312_p2 = pnand %p310_p1, %p307_p0 }
   0x6   :  { %315 = shalt.err (!%p312_p2)
}
   0x7   :  { %s316_s15 = scalar_lea.vmem %s14_s7, 16  ;;  %s320_s16 = scalar_lea.vmem %s14_s7, 32 }
   0x8   :  { %p317_p3 = scmp.ne.s32.totalorder %s14_s7, %s316_s15  ;;  %p321_p4 = scmp.lt.s32.totalorder %s14_s7, %s14_s7 }
   0x9   :  { %p322_p5 = scmp.lt.s32.totalorder %s320_s16, %s316_s15 }
   0xb   :  { %p323_p6 = por %p322_p5, %p321_p4 }
   0xd   :  { %p324_p7 = pnand %p323_p6, %p317_p3 }
   0xf   :  { %327 = shalt.err (!%p324_p7)
}
  0x10   :  { %16 = dma.hbm_to_vmem [thread:$0]  %s438_s0, 16, %s14_s7, [#allocation3]  }
  0x11   :  { %328 = dma.done.wait [#allocation3], 16  }
  0x12   :  { %329 = vsyncadd [#allocation3], 4294967280  ;;  %v20_v0 = vlaneseq  ;;  %v269_v11 = vld [vmem:[#allocation2] ss:$0 sm:$0xff]  ;;  %v331_v15 = vmov 1.5707964  }
  0x13   :  { %v332_v43 = vmov 683565275   ;;  %v333_v45 = vmov 2475754826   ;;  %v334_v47 = vmov 2131351028  }
  0x14   :  { %v21_v1 = vshrl.u32 %v20_v0, 7  ;;  %v335_v49 = vmov 2102212464   ;;  %v336_v51 = vmov 920167782  }
  0x15   :  { %v337_v59 = vmov 1326507024  }
  0x16   :  { %v22_v2 = vadd.s32 8, %v21_v1  ;;  %vm23_vm0 = vcmp.lt.s32.totalorder %v21_v1, 5  ;;  %v267_v3 = vadd.s32 4294967291, %v21_v1 }
  0x17   :  { %v37_v16 = vsel %vm23_vm0, 0.0, %v331_v15 }
  0x18   :  { %v268_v4 = vadd.s32 4294967291, %v22_v2  ;;  %v27_v5 = vsel %vm23_vm0, %v21_v1, %v267_v3 }
  0x19   :  { %v29_v6 = vcvt.s32.f32 %v27_v5 }
  0x1a   :  { %v30_v7 = vcvt.s32.f32 %v268_v4 }
  0x1b   :  { %v31_v8 = vadd.f32 1.0, %v29_v6 }
  0x1c   :  { %v32_v9 = vadd.f32 1.0, %v30_v7 }
  0x1d   :  { %294 = vrcp.f32 %v31_v8 }
  0x1e   :  { %296 = vrcp.f32 %v32_v9 }
  0x27   :  { %v295_v10 = vpop.eup %294 }
  0x28   :  { %v297_v12 = vpop.eup %296  ;;  %v34_v13 = vmul.f32 3.1415927, %v295_v10 }
  0x29   :  { %v36_v14 = vmul.f32 3.1415927, %v297_v12 }
  0x2a   :  { %v46_v17 = vmul.f32 %v269_v11, %v34_v13 }
  0x2b   :  { %v47_v18 = vmul.f32 %v269_v11, %v36_v14 }
  0x2c   :  { %v362_v19 = vadd.f32 %v46_v17, %v37_v16 }
  0x2d   :  { %v364_v20 = vadd.f32 1.5707964, %v47_v18 }
  0x2e   :  { %v50_v21 = vand.u32 2147483647, %v362_v19  ;;  %v53_v22 = vand.u32 2139095040, %v362_v19  ;;  %vm52_vm15 = vcmp.lt.s32.totalorder %v362_v19, 0 }
  0x2f   :  { %v154_v23 = vand.u32 2147483647, %v364_v20  ;;  %v157_v24 = vand.u32 2139095040, %v364_v20 }
  0x30   :  { %v54_v25 = vshrl.u32 %v53_v22, 23  ;;  %v57_v26 = vand.u32 8388607, %v50_v21  ;;  %vm51_vm0 = vcmp.le.f32.partialorder %v50_v21, 0.7853982 }
  0x31   :  { %v158_v27 = vshrl.u32 %v157_v24, 23  ;;  %v161_v28 = vand.u32 8388607, %v154_v23 }
  0x32   :  { %v270_v29 = vadd.s32 4294967169, %v54_v25  ;;  %v58_v32 = vor.u32 8388608, %v57_v26 }
  0x33   :  { %v274_v30 = vadd.s32 4294967169, %v158_v27  ;;  %v162_v33 = vor.u32 8388608, %v161_v28 }
  0x34   :  { %v60_v31 = vadd.s32 1, %v270_v29  ;;  %v374_v39 = vshll.u32 %v58_v32, 8 }
  0x35   :  { %v164_v34 = vadd.s32 1, %v274_v30  ;;  %v376_v41 = vshll.u32 %v162_v33, 8 }
  0x36   :  { %vm61_vm1 = vcmp.gt.s32.totalorder %v60_v31, 0 }
  0x37   :  { %v62_v35 = vsel %vm61_vm1, %v60_v31, 0  ;;  %vm165_vm2 = vcmp.gt.s32.totalorder %v164_v34, 0  ;;  %vm156_vm1 = vcmp.lt.s32.totalorder %v364_v20, 0 }
  0x38   :  { %v63_v36 = vshrl.u32 %v62_v35, 5  ;;  %v64_v37 = vand.u32 31, %v62_v35  ;;  %v166_v38 = vsel %vm165_vm2, %v164_v34, 0  ;;  %vm155_vm2 = vcmp.le.f32.partialorder %v154_v23, 0.7853982 }
  0x39   :  { %v168_v40 = vand.u32 31, %v166_v38  ;;  %v378_v53 = vshrl.u32 %v166_v38, 5 }
  0x3a   :  { %v65_v42 = vsub.s32 32, %v64_v37  ;;  %v67_v44 = vshll.u32 %v332_v43, %v64_v37  ;;  %v70_v46 = vshll.u32 %v333_v45, %v64_v37  ;;  %v73_v48 = vshll.u32 %v334_v47, %v64_v37 }
  0x3b   :  { %v76_v50 = vshll.u32 %v335_v49, %v64_v37  ;;  %v79_v52 = vshll.u32 %v336_v51, %v64_v37  ;;  %vm82_vm3 = vcmp.lt.s32.totalorder %v63_v36, 1  ;;  %vm83_vm4 = vcmp.lt.s32.totalorder %v63_v36, 2 }
  0x3c   :  { %v66_v54 = vshrl.u32 %v332_v43, %v65_v42  ;;  %v68_v55 = vshrl.u32 %v333_v45, %v65_v42  ;;  %v71_v56 = vshrl.u32 %v334_v47, %v65_v42  ;;  %v74_v57 = vshrl.u32 %v335_v49, %v65_v42 }
  0x3d   :  { %v77_v58 = vshrl.u32 %v336_v51, %v65_v42  ;;  %v80_v60 = vshrl.u32 %v337_v59, %v65_v42  ;;  %vm85_vm5 = vcmp.lt.s32.totalorder %v63_v36, 4  ;;  %v169_v0 = vsub.s32 32, %v168_v40 }
  0x3e   :  { %v69_v61 = vor.u32 %v68_v55, %v67_v44  ;;  %v72_v62 = vor.u32 %v71_v56, %v70_v46  ;;  %v75_v63 = vor.u32 %v74_v57, %v73_v48  ;;  %vm84_vm6 = vcmp.lt.s32.totalorder %v63_v36, 3 }
  0x3f   :  { %v78_v1 = vor.u32 %v77_v58, %v76_v50  ;;  %v81_v2 = vor.u32 %v80_v60, %v79_v52  ;;  %v171_v3 = vshll.u32 %v332_v43, %v168_v40  ;;  %v174_v11 = vshll.u32 %v333_v45, %v168_v40 }
  0x40   :  { %v86_v4 = vsel %vm82_vm3, %v66_v54, %v69_v61  ;;  %v87_v5 = vsel %vm85_vm5, %v75_v63, 2102212464  ;;  %v90_v6 = vsel %vm82_vm3, %v69_v61, %v72_v62  ;;  %v94_v7 = vsel %vm82_vm3, %v72_v62, %v75_v63 }
  0x41   :  { %v88_v8 = vsel %vm84_vm6, %v72_v62, %v87_v5  ;;  %v91_v9 = vsel %vm85_vm5, %v78_v1, 920167782  ;;  %v95_v10 = vsel %vm85_vm5, %v81_v2, 1326507024  ;;  %v170_v14 = vshrl.u32 %v332_v43, %v169_v0 }
  0x42   :  { %v92_v12 = vsel %vm84_vm6, %v75_v63, %v91_v9  ;;  %v96_v13 = vsel %vm84_vm6, %v78_v1, %v95_v10  ;;  %v172_v15 = vshrl.u32 %v333_v45, %v169_v0  ;;  %v89_v16 = vsel %vm83_vm4, %v86_v4, %v88_v8 }
  0x43   :  { %v93_v17 = vsel %vm83_vm4, %v90_v6, %v92_v12  ;;  %v97_v18 = vsel %vm83_vm4, %v94_v7, %v96_v13  ;;  %v175_v22 = vshrl.u32 %v334_v47, %v169_v0  ;;  %v177_v30 = vshll.u32 %v334_v47, %v168_v40 }
  0x44   :  { %v387_v24 = vmul.u32.u64.low %v374_v39, %v97_v18  ;;  %v388_v25 = vmul.u32.u64.high %v374_v39, %v97_v18, %v387_v24  ;;  %v391_v26 = vmul.u32.u64.low %v374_v39, %v93_v17  ;;  %v392_v27 = vmul.u32.u64.high %v374_v39, %v93_v17, %v391_v26 }
  0x45   :  { %v173_v28 = vor.u32 %v172_v15, %v171_v3  ;;  %v176_v29 = vor.u32 %v175_v22, %v174_v11  ;;  %v178_v31 = vshrl.u32 %v335_v49, %v169_v0  ;;  %v180_v32 = vshll.u32 %v335_v49, %v168_v40 }
  0x46   :  { %v181_v33 = vshrl.u32 %v336_v51, %v169_v0  ;;  %v183_v34 = vshll.u32 %v336_v51, %v168_v40  ;;  %v184_v35 = vshrl.u32 %v337_v59, %v169_v0  ;;  %v105_v36 = vmul.u32 %v374_v39, %v89_v16 }
  0x47   :  { %v179_v37 = vor.u32 %v178_v31, %v177_v30  ;;  %vm186_vm7 = vcmp.lt.s32.totalorder %v378_v53, 1  ;;  %vm187_vm8 = vcmp.lt.s32.totalorder %v378_v53, 2  ;;  %vm107_vm9 = vc.u32 %v388_v25, %v391_v26 }
  0x48   :  { %v108_v38 = vadd.s32 1, %v392_v27  ;;  %v182_v42 = vor.u32 %v181_v33, %v180_v32  ;;  %vm188_vm10 = vcmp.lt.s32.totalorder %v378_v53, 3  ;;  %v185_v43 = vor.u32 %v184_v35, %v183_v34 }
  0x49   :  { %vm189_vm11 = vcmp.lt.s32.totalorder %v378_v53, 4  ;;  %v190_v44 = vsel %vm186_vm7, %v170_v14, %v173_v28  ;;  %v194_v40 = vsel %vm186_vm7, %v173_v28, %v176_v29  ;;  %v198_v47 = vsel %vm186_vm7, %v176_v29, %v179_v37 }
  0x4a   :  { %v109_v45 = vsel %vm107_vm9, %v108_v38, %v392_v27  ;;  %v191_v39 = vsel %vm189_vm11, %v179_v37, 2102212464  ;;  %v195_v46 = vsel %vm189_vm11, %v182_v42, 920167782  ;;  %v199_v51 = vsel %vm189_vm11, %v185_v43, 1326507024 }
  0x4b   :  { %v110_v48 = vadd.s32 %v109_v45, %v105_v36  ;;  %v192_v49 = vsel %vm188_vm10, %v176_v29, %v191_v39  ;;  %v196_v50 = vsel %vm188_vm10, %v179_v37, %v195_v46  ;;  %v200_v55 = vsel %vm188_vm10, %v182_v42, %v199_v51 }
  0x4c   :  { %v193_v52 = vsel %vm187_vm8, %v190_v44, %v192_v49  ;;  %v197_v54 = vsel %vm187_vm8, %v194_v40, %v196_v50  ;;  %v201_v57 = vsel %vm187_vm8, %v198_v47, %v200_v55  ;;  %v106_v12 = vadd.s32 %v391_v26, %v388_v25 }
  0x4d   :  { %v111_v56 = vadd.s32 536870912, %v110_v48  ;;  %v409_v58 = vmul.u32.u64.low %v376_v41, %v197_v54  ;;  %v410_v59 = vmul.u32.u64.high %v376_v41, %v197_v54, %v409_v58  ;;  %v209_v63 = vmul.u32 %v376_v41, %v193_v52 }
  0x4e   :  { %v413_v60 = vmul.u32.u64.low %v376_v41, %v201_v57  ;;  %v414_v61 = vmul.u32.u64.high %v376_v41, %v201_v57, %v413_v60  ;;  %vm142_vm6 = vweird.f32 %v362_v19  ;;  %vm258_vm7 = vcmask 64512  }
  0x4f   :  { %v112_v62 = vshrl.u32 %v111_v56, 30  ;;  %v212_v1 = vadd.s32 1, %v410_v59  ;;  %vm246_vm11 = vweird.f32 %v364_v20 }
  0x50   :  { %vm211_vm12 = vc.u32 %v414_v61, %v409_v58  ;;  %v210_v32 = vadd.s32 %v409_v58, %v414_v61 }
  0x51   :  { %v113_v0 = vshll.u32 %v112_v62, 30  ;;  %v213_v53 = vsel %vm211_vm12, %v212_v1, %v410_v59  ;;  %v136_v25 = vsub.s32 4, %v112_v62  ;;  %vm260_vm12 = vcmask 58368  }
  0x52   :  { %v214_v3 = vadd.s32 %v213_v53, %v209_v63 }
  0x53   :  { %v114_v2 = vsub.s32 %v110_v48, %v113_v0  ;;  %v137_v44 = vsel %vm52_vm15, %v136_v25, %v112_v62 }
  0x54   :  { %v215_v5 = vadd.s32 536870912, %v214_v3  ;;  %v139_v47 = vsel %vm51_vm0, 0, %v137_v44 }
  0x55   :  { %v116_v4 = vsub.s32 0, %v114_v2  ;;  %v143_v52 = vadd.s32 3, %v139_v47 }
  0x56   :  { %v216_v7 = vshrl.u32 %v215_v5, 30 }
  0x57   :  { %v271_v6 = vmin.u32 %v116_v4, %v114_v2  ;;  %v144_v56 = vand.u32 3, %v143_v52 }
  0x58   :  { %v217_v9 = vshll.u32 %v216_v7, 30  ;;  %v240_v51 = vsub.s32 4, %v216_v7 }
  0x59   :  { %v118_v8 = vclz %v271_v6  ;;  %vm149_vm3 = vcmp.eq.s32.totalorder %v144_v56, 2  ;;  %vm146_vm4 = vcmp.eq.s32.totalorder %v144_v56, 0  ;;  %vm145_vm5 = vcmp.lt.s32.totalorder %v144_v56, 2 }
  0x5a   :  { %v218_v11 = vsub.s32 %v214_v3, %v217_v9  ;;  %v241_v55 = vsel %vm156_vm1, %v240_v51, %v216_v7 }
  0x5b   :  { %v272_v10 = vadd.s32 4294967294, %v118_v8  ;;  %v243_v59 = vsel %vm155_vm2, 0, %v241_v55 }
  0x5c   :  { %v220_v13 = vsub.s32 0, %v218_v11  ;;  %v247_v63 = vadd.s32 3, %v243_v59 }
  0x5d   :  { %vm273_vm13 = vcmp.lt.s32.totalorder %v272_v10, 0 }
  0x5e   :  { %v121_v41 = vsel %vm273_vm13, 0, %v272_v10  ;;  %v275_v17 = vmin.u32 %v220_v13, %v218_v11  ;;  %v248_v53 = vand.u32 3, %v247_v63 }
  0x5f   :  { %v122_v14 = vsub.s32 32, %v121_v41  ;;  %v123_v15 = vshll.u32 %v114_v2, %v121_v41  ;;  %v126_v16 = vsub.s32 4294967266, %v121_v41 }
  0x60   :  { %v222_v24 = vclz %v275_v17  ;;  %vm253_vm8 = vcmp.eq.s32.totalorder %v248_v53, 2  ;;  %vm250_vm9 = vcmp.eq.s32.totalorder %v248_v53, 0  ;;  %vm249_vm10 = vcmp.lt.s32.totalorder %v248_v53, 2 }
  0x61   :  { %v124_v18 = vshrl.u32 %v106_v12, %v122_v14  ;;  %v127_v22 = vadd.s32 127, %v126_v16 }
  0x62   :  { %v276_v29 = vadd.s32 4294967294, %v222_v24 }
  0x63   :  { %v125_v27 = vor.u32 %v124_v18, %v123_v15  ;;  %v128_v28 = vshll.u32 %v127_v22, 23 }
  0x64   :  { %vm277_vm14 = vcmp.lt.s32.totalorder %v276_v29, 0 }
  0x65   :  { %v129_v30 = vor.u32 4788187, %v128_v28  ;;  %v132_v31 = vcvt.s32.f32 %v125_v27  ;;  %v225_v26 = vsel %vm277_vm14, 0, %v276_v29 }
  0x66   :  { %v226_v34 = vsub.s32 32, %v225_v26  ;;  %v227_v35 = vshll.u32 %v218_v11, %v225_v26  ;;  %v230_v36 = vsub.s32 4294967266, %v225_v26 }
  0x67   :  { %v130_v33 = vand.u32 2147483647, %v129_v30 }
  0x68   :  { %v228_v38 = vshrl.u32 %v210_v32, %v226_v34  ;;  %v231_v42 = vadd.s32 127, %v230_v36 }
  0x69   :  { %v133_v37 = vmul.f32 %v132_v31, %v130_v33 }
  0x6a   :  { %v229_v40 = vor.u32 %v228_v38, %v227_v35  ;;  %v232_v45 = vshll.u32 %v231_v42, 23 }
  0x6b   :  { %v134_v43 = vxor.u32 2147483648, %v133_v37 }
  0x6c   :  { %v233_v48 = vor.u32 4788187, %v232_v45  ;;  %v236_v49 = vcvt.s32.f32 %v229_v40 }
  0x6d   :  { %v135_v39 = vsel %vm52_vm15, %v134_v43, %v133_v37 }
  0x6e   :  { %v138_v46 = vsel %vm51_vm0, %v362_v19, %v135_v39  ;;  %v234_v50 = vand.u32 2147483647, %v233_v48 }
  0x6f   :  { %298 = vcosq.f32 %v138_v46 }
  0x70   :  { %300 = vsinq.f32 %v138_v46  ;;  %v237_v54 = vmul.f32 %v236_v49, %v234_v50 }
  0x72   :  { %v238_v21 = vxor.u32 2147483648, %v237_v54 }
  0x74   :  { %v239_v57 = vsel %vm156_vm1, %v238_v21, %v237_v54 }
  0x75   :  { %v242_v58 = vsel %vm155_vm2, %v364_v20, %v239_v57 }
  0x76   :  { %302 = vcosq.f32 %v242_v58 }
  0x77   :  { %304 = vsinq.f32 %v242_v58 }
  0x79   :  { %v299_v60 = vpop.eup %298 }
  0x7a   :  { %v301_v61 = vpop.eup %300  ;;  %v150_v62 = vxor.u32 2147483648, %v299_v60 }
  0x7b   :  { %v147_v0 = vxor.u32 2147483648, %v301_v61 }
  0x7c   :  { %v151_v23 = vsel %vm149_vm3, %v150_v62, %v301_v61 }
  0x7d   :  { %v148_v1 = vsel %vm146_vm4, %v299_v60, %v147_v0 }
  0x7e   :  { %v152_v2 = vsel %vm145_vm5, %v148_v1, %v151_v23 }
  0x7f   :  { %v153_v3 = vsel %vm142_vm6, nan, %v152_v2 }
  0x80   :  { %259 = vst.msk [vmem:[%s439_s1] sm:$0xff] %vm258_vm7, %v153_v3  ;;  %v303_v4 = vpop.eup %302 }
  0x81   :  { %v305_v5 = vpop.eup %304  ;;  %v254_v6 = vxor.u32 2147483648, %v303_v4 }
  0x82   :  { %v251_v7 = vxor.u32 2147483648, %v305_v5 }
  0x83   :  { %v255_v19 = vsel %vm253_vm8, %v254_v6, %v305_v5 }
  0x84   :  { %v252_v8 = vsel %vm250_vm9, %v303_v4, %v251_v7 }
  0x85   :  { %v256_v9 = vsel %vm249_vm10, %v252_v8, %v255_v19 }
  0x86   :  { %v257_v10 = vsel %vm246_vm11, nan, %v256_v9 }
  0x87   :  { %261 = vst.msk [vmem:[%s439_s1 + $0x8] sm:$0x3] %vm260_vm12, %v257_v10 }
  0x88   :  { %266 = vsyncpa [#allocation3], 1 }

</bundles_post_ra>
